<compile_context>
chip_gen: v7x
topology: tpu7x:2x2x1
jax: 0.10.0
libtpu: 0.0.40
codegen_flags: <defaults>
</compile_context>

<pallas_src>
import functools

import jax
import jax.numpy as jnp
from jax.experimental import pallas as pl
from jax.experimental.pallas import tpu as pltpu


_VMEM_BUDGET_BYTES = 16 * 1024 * 1024   # conservative: fits v7x's 32 MiB scoped default
_MAX_SELECT_BYTES = 4 * 1024 * 1024     # cap on the (P, P_out) stride-selection matrix


def _round_up(x, m):
    return ((x + m - 1) // m) * m


def _cdiv(a, b):
    return (a + b - 1) // b


# ---------------------------------------------------------------------------
# Kernels
# ---------------------------------------------------------------------------
def _pconv_kernel(w_ref, x_ref, o_ref, *, apply_relu, bb):
    # w_ref: (Cout, Cin)   block-diagonal weight (shuffle folded into rows); constant
    #                      block index -> stays resident in VMEM across the grid.
    # x_ref: (bb, Cin, TN) pixel tiles (NC(HW) layout, pixels on the lane axis).
    # o_ref: (bb, Cout, TN) lane-dense output tiles.
    w = w_ref[...]
    for i in range(bb):                       # static unroll over the batch block
        acc = jnp.dot(w, x_ref[i], preferred_element_type=jnp.float32)
        if apply_relu:
            acc = jnp.maximum(acc, 0.0)
        o_ref[i] = acc.astype(o_ref.dtype)


def _pconv_stride_kernel(w_ref, s_ref, x_ref, o_ref, *, apply_relu, bb):
    # Strided 1x1 conv: the spatial subsample is an exact 0/1 selection matmul
    # (runs on the MXU, hidden under the HBM-bound DMA) applied before the channel
    # matmul:   y = relu(W @ (x @ S)).
    # w_ref: (Cout, Cin); s_ref: (P, P_out); x_ref: (bb, Cin, P); o_ref: (bb, Cout, P_out)
    w = w_ref[...]
    s = s_ref[...]
    for i in range(bb):
        xs = jnp.dot(x_ref[i], s, preferred_element_type=jnp.float32)
        xs = xs.astype(w.dtype)               # exact: S is 0/1, inputs already in w.dtype
        acc = jnp.dot(w, xs, preferred_element_type=jnp.float32)
        if apply_relu:
            acc = jnp.maximum(acc, 0.0)
        o_ref[i] = acc.astype(o_ref.dtype)


# ---------------------------------------------------------------------------
# pallas_call wrappers
# ---------------------------------------------------------------------------
def _dense_pconv(x_bcp, w_full, *, apply_relu, tile_n, out_dtype):
    """x_bcp: (B, Cin, P); w_full: (Cout, Cin). Returns (B, Cout, P) in out_dtype."""
    B, Cin, P = x_bcp.shape
    Cout = w_full.shape[0]
    itemsize = max(jnp.dtype(x_bcp.dtype).itemsize, jnp.dtype(out_dtype).itemsize)

    # Pixel tile: as fat as the VMEM budget allows (multiple of 128 lanes, no padding;
    # the last block may be partial thanks to cdiv grid sizing).
    tn = min(_round_up(tile_n, 128), _round_up(P, 128))
    while tn > 128 and 2 * (Cin + Cout) * tn * itemsize > _VMEM_BUDGET_BYTES:
        tn -= 128
    n_pix = _cdiv(P, tn)

    # Batch block: fatten grid steps for small-spatial stages (per-step overhead ~0.35us).
    bb = max(1, _round_up(tile_n, 128) // tn)
    bb = min(bb, B)
    while bb > 1 and 2 * bb * (Cin + Cout) * tn * itemsize > _VMEM_BUDGET_BYTES:
        bb -= 1
    if n_pix == 1 and B > 1:
        # Keep at least 2 independent grid units so v7x's two TensorCores both work.
        bb = min(bb, _cdiv(B, 2))

    kernel = functools.partial(_pconv_kernel, apply_relu=apply_relu, bb=bb)
    return pl.pallas_call(
        kernel,
        out_shape=jax.ShapeDtypeStruct((B, Cout, P), out_dtype),
        grid_spec=pl.GridSpec(
            grid=(_cdiv(B, bb), n_pix),
            in_specs=[
                # Weight: full array, constant block index -> fetched once, resident.
                pl.BlockSpec((Cout, Cin), lambda b, n: (0, 0)),
                # Activations: bb images x one (Cin, tn) pixel slab per step.
                pl.BlockSpec((bb, Cin, tn), lambda b, n: (b, 0, n)),
            ],
            out_specs=pl.BlockSpec((bb, Cout, tn), lambda b, n: (b, 0, n)),
        ),
        compiler_params=pltpu.CompilerParams(
            dimension_semantics=("parallel", "parallel")),
    )(w_full, x_bcp)


def _dense_pconv_strided(x_bcp, w_full, sel, *, apply_relu, out_dtype):
    """Strided 1x1 conv on flat pixels. x_bcp: (B, Cin, P); sel: (P, P_out)."""
    B, Cin, P = x_bcp.shape
    Cout = w_full.shape[0]
    P_out = sel.shape[1]
    itemsize = max(jnp.dtype(x_bcp.dtype).itemsize, jnp.dtype(out_dtype).itemsize)

    per_image = (Cin * P + Cout * P_out) * itemsize
    bb = max(1, _VMEM_BUDGET_BYTES // (2 * per_image))
    bb = min(bb, B)
    if B > 1:
        bb = min(bb, _cdiv(B, 2))            # keep >= 2 grid steps for v7x's two TCs

    kernel = functools.partial(_pconv_stride_kernel, apply_relu=apply_relu, bb=bb)
    return pl.pallas_call(
        kernel,
        out_shape=jax.ShapeDtypeStruct((B, Cout, P_out), out_dtype),
        grid_spec=pl.GridSpec(
            grid=(_cdiv(B, bb),),
            in_specs=[
                pl.BlockSpec((Cout, Cin), lambda b: (0, 0)),     # resident weight
                pl.BlockSpec((P, P_out), lambda b: (0, 0)),      # resident selection
                pl.BlockSpec((bb, Cin, P), lambda b: (b, 0, 0)),
            ],
            out_specs=pl.BlockSpec((bb, Cout, P_out), lambda b: (b, 0, 0)),
        ),
        compiler_params=pltpu.CompilerParams(dimension_semantics=("parallel",)),
    )(w_full, sel, x_bcp)


# ---------------------------------------------------------------------------
# Public forward
# ---------------------------------------------------------------------------
def group_pointwise_conv_forward(x_nchw, weight, *, groups, stride=1,
                                 isrelu=True, shuffle=True, tile_n=2048,
                                 compute_dtype=None, out_dtype=None):
    """Replicates groupPointwiseConv.forward (bias=False, isbn=False).

    x_nchw : (B, Cin, H, W)
    weight : (Cout, Cin // groups, 1, 1)  -- PyTorch Conv2d weight layout
    compute_dtype : e.g. jnp.bfloat16 halves HBM read traffic (f32 accumulation kept).
    out_dtype     : defaults to compute_dtype (or the input dtype); bf16 in + bf16 out
                    also halves the write traffic for this HBM-bound kernel.
    """
    # TODO(synk): the isbn=True (BatchNorm) path of the module is not kernelized
    # (module default is isbn=False).
    B, Cin, H, W = x_nchw.shape
    Cout = weight.shape[0]
    cin_g = Cin // groups
    cout_g = Cout // groups
    assert weight.shape[1] == cin_g

    # --- weight prep (tiny, done once outside the kernel) ---------------------
    # Block-diagonal W (Cout, Cin): row oc = g*cout_g + j reads cols [g*cin_g, (g+1)*cin_g).
    # TODO(synk): on v5e with very large per-group channels (cin_g >= 128, f32) the
    # groups-fold FLOP inflation can become MXU-bound; a grouped-grid variant (or
    # compute_dtype=bf16) would be preferable there.
    w_g = weight.reshape(groups, cout_g, cin_g)
    eye = jnp.eye(groups, dtype=weight.dtype)
    w_full = jnp.einsum("gji,gh->gjhi", w_g, eye).reshape(Cout, Cin)

    if shuffle and groups > 1:
        # Fold channel_shuffle into W's rows:
        #   new output channel j*groups + g == old output channel g*cout_g + j.
        w_full = (w_full.reshape(groups, cout_g, Cin)
                        .transpose(1, 0, 2)
                        .reshape(Cout, Cin))

    compute_dt = compute_dtype if compute_dtype is not None else x_nchw.dtype
    out_dt = out_dtype if out_dtype is not None else compute_dt

    x_flat = x_nchw.reshape(B, Cin, H * W)          # free reshape, NCHW kept
    if x_flat.dtype != compute_dt:
        x_flat = x_flat.astype(compute_dt)
    if w_full.dtype != compute_dt:
        w_full = w_full.astype(compute_dt)

    if stride == 1:
        H_out, W_out = H, W
        y = _dense_pconv(x_flat, w_full, apply_relu=isrelu, tile_n=tile_n,
                         out_dtype=out_dt)
    else:
        H_out = (H - 1) // stride + 1
        W_out = (W - 1) // stride + 1
        P, P_out = H * W, H_out * W_out
        itemsize = jnp.dtype(compute_dt).itemsize
        sel_bytes = P * P_out * itemsize
        per_image = (Cin * P + Cout * P_out) * max(itemsize,
                                                   jnp.dtype(out_dt).itemsize)
        if sel_bytes <= _MAX_SELECT_BYTES and 2 * per_image <= _VMEM_BUDGET_BYTES:
            # Fold the spatial subsample into the kernel (no extra HBM gather pass):
            # S[p_in, p_out] = 1 where p_in = (stride*h)*W + stride*w.
            p_in = ((jnp.arange(H_out) * stride * W)[:, None]
                    + jnp.arange(W_out) * stride).reshape(-1)
            sel = jnp.zeros((P, P_out), dtype=compute_dt)
            sel = sel.at[p_in, jnp.arange(P_out)].set(1)
            y = _dense_pconv_strided(x_flat, w_full, sel, apply_relu=isrelu,
                                     out_dtype=out_dt)
        else:
            # Fallback: materialized strided slice + the stride-1 kernel.
            xs = x_nchw[:, :, ::stride, ::stride].astype(compute_dt)
            y = _dense_pconv(xs.reshape(B, Cin, P_out), w_full,
                             apply_relu=isrelu, tile_n=tile_n, out_dtype=out_dt)

    return y.reshape(B, Cout, H_out, W_out)


# ---------------------------------------------------------------------------
# Pure-JAX reference of the PyTorch forward, for validation.
# ---------------------------------------------------------------------------
def _reference_forward(x_nchw, weight, *, groups, stride=1, isrelu=True, shuffle=True):
    B, Cin, H, W = x_nchw.shape
    Cout = weight.shape[0]
    cin_g = Cin // groups
    cout_g = Cout // groups
    if stride != 1:
        x_nchw = x_nchw[:, :, ::stride, ::stride]
        H, W = x_nchw.shape[2], x_nchw.shape[3]
    x_g = x_nchw.reshape(B, groups, cin_g, H, W)
    w_g = weight.reshape(groups, cout_g, cin_g)
    y = jnp.einsum("bgihw,goi->bgohw", x_g, w_g).reshape(B, Cout, H, W)
    if isrelu:
        y = jnp.maximum(y, 0.0)
    if shuffle and groups > 1:
        y = y.reshape(B, groups, cout_g, H, W)
        y = jnp.transpose(y, (0, 2, 1, 3, 4)).reshape(B, Cout, H, W)
    return y


if __name__ == "__main__":
    # nin must be > 24 for the module to use groups=4 + shuffle.
    B, Cin, H, W = 2, 32, 8, 8
    Cout = 32
    groups = 4

    key = jax.random.PRNGKey(0)
    kx, kw = jax.random.split(key)
    x = jax.random.normal(kx, (B, Cin, H, W), dtype=jnp.float32)
    # Deterministic Conv2d weight init (kaiming-uniform-like bound), bias=False.
    fan_in = (Cin // groups) * 1 * 1
    bound = 1.0 / (fan_in ** 0.5)
    weight = jax.random.uniform(kw, (Cout, Cin // groups, 1, 1),
                                dtype=jnp.float32, minval=-bound, maxval=bound)

    # Main path: stride=1, ReLU, channel shuffle folded into the weight (f32).
    out = group_pointwise_conv_forward(x, weight, groups=groups,
                                       stride=1, isrelu=True, shuffle=True)
    out = jax.block_until_ready(out)
    ref = _reference_forward(x, weight, groups=groups, stride=1,
                             isrelu=True, shuffle=True)
    assert out.shape == (B, Cout, H, W)
    assert jnp.allclose(out, ref, atol=1e-5, rtol=1e-5), "mismatch vs reference (shuffle)"

    # stride=2 path: spatial subsample folded into the kernel via the selection matmul.
    out2 = group_pointwise_conv_forward(x, weight, groups=groups,
                                        stride=2, isrelu=True, shuffle=False)
    out2 = jax.block_until_ready(out2)
    ref2 = _reference_forward(x, weight, groups=groups, stride=2,
                              isrelu=True, shuffle=False)
    assert out2.shape == ref2.shape
    assert jnp.allclose(out2, ref2, atol=1e-5, rtol=1e-5), "mismatch vs reference (stride)"

    # bf16 compute + bf16 output path (halves read AND write HBM traffic).
    out3 = group_pointwise_conv_forward(x, weight, groups=groups,
                                        stride=1, isrelu=True, shuffle=True,
                                        compute_dtype=jnp.bfloat16)
    out3 = jax.block_until_ready(out3)
    assert out3.dtype == jnp.bfloat16 and out3.shape == (B, Cout, H, W)
    assert jnp.allclose(out3.astype(jnp.float32), ref, atol=5e-2, rtol=5e-2), \
        "mismatch vs reference (bf16)"

    print("KERNEL_OK")
</pallas_src>

<mosaic_0001>
module attributes {stable_mosaic.version = 11 : i64} {
  func.func @_pconv_kernel(%arg0: i32, %arg1: i32, %arg2: memref<32x32xf32, #tpu.memory_space<vmem>>, %arg3: memref<1x32x128xf32, #tpu.memory_space<vmem>>, %arg4: memref<1x32x128xf32, #tpu.memory_space<vmem>>) attributes {dimension_semantics = [#tpu.dimension_semantics<parallel>, #tpu.dimension_semantics<parallel>], iteration_bounds = array<i64: 2, 1>, scalar_prefetch = 0 : i64, scratch_operands = 0 : i64, tpu.core_type = #tpu.core_type<tc>, window_params = [{pipeline_mode = #tpu.pipeline_mode<synchronous>, transform_indices = @transform_0, window_bounds = array<i64: 32, 32>}, {transform_indices = @transform_1, window_bounds = array<i64: 1, 32, 128>}, {transform_indices = @transform_2, window_bounds = array<i64: 1, 32, 128>}]} {
    %c0 = arith.constant 0 : index
    %c0_0 = arith.constant 0 : index
    %0 = vector.load %arg2[%c0, %c0_0] : memref<32x32xf32, #tpu.memory_space<vmem>>, vector<32x32xf32>
    %c0_1 = arith.constant 0 : index
    %c0_2 = arith.constant 0 : index
    %c0_3 = arith.constant 0 : index
    %1 = vector.load %arg3[%c0_1, %c0_2, %c0_3] : memref<1x32x128xf32, #tpu.memory_space<vmem>>, vector<1x32x128xf32>
    %2 = vector.shape_cast %1 : vector<1x32x128xf32> to vector<32x128xf32>
    %cst = arith.constant dense<0.000000e+00> : vector<32x128xf32>
    %3 = tpu.matmul %0, %2, %cst {dimension_numbers = #tpu.dot_dimension_numbers<[1], [0], [0], [1], [0, 0, 1, 1], [], []>} : vector<32x32xf32>, vector<32x128xf32>, vector<32x128xf32> -> vector<32x128xf32>
    %cst_4 = arith.constant 0.000000e+00 : f32
    %4 = vector.broadcast %cst_4 : f32 to vector<32x128xf32>
    %5 = arith.maximumf %3, %4 : vector<32x128xf32>
    %c0_5 = arith.constant 0 : index
    %c0_6 = arith.constant 0 : index
    %c0_7 = arith.constant 0 : index
    %6 = vector.load %arg4[%c0_5, %c0_6, %c0_7] : memref<1x32x128xf32, #tpu.memory_space<vmem>>, vector<1x32x128xf32>
    %7 = vector.shape_cast %6 : vector<1x32x128xf32> to vector<32x128xf32>
    %8 = vector.shape_cast %5 : vector<32x128xf32> to vector<1x32x128xf32>
    tpu.vector_store %arg4[%c0_5, %c0_6, %c0_7], %8 {strides = array<i32>} : memref<1x32x128xf32, #tpu.memory_space<vmem>>, vector<1x32x128xf32>,
    return
  }
  func.func @transform_0(%arg0: i32, %arg1: i32) -> (i32, i32) {
    %c0_i32 = arith.constant 0 : i32
    %c0_i32_0 = arith.constant 0 : i32
    %c0_i32_1 = arith.constant 0 : i32
    return %c0_i32, %c0_i32_0 : i32, i32
  }
  func.func @transform_1(%arg0: i32, %arg1: i32) -> (i32, i32, i32) {
    %c0_i32 = arith.constant 0 : i32
    %c0_i32_0 = arith.constant 0 : i32
    return %arg0, %c0_i32, %arg1 : i32, i32, i32
  }
  func.func @transform_2(%arg0: i32, %arg1: i32) -> (i32, i32, i32) {
    %c0_i32 = arith.constant 0 : i32
    %c0_i32_0 = arith.constant 0 : i32
    return %arg0, %c0_i32, %arg1 : i32, i32, i32
  }
}

</mosaic_0001>

<bundles_post_ra>
// kernel: tpu_custom_call.1
= control target key start
LH: loop header
LB: loop body
LE: loop exit
PB: predicated region body
PF: predicated region fallthrough
CT: control target
= control target key end

     0   :  { %7 = vsyncpa [#allocation3], 0  ;;  %s951_s0 = inlined_call_operand.hbm [shape: f32[32,32], index: 0, kind: input, shape index: {}]   ;;  %s952_s1 = inlined_call_operand.hbm [shape: f32[2,32,64], index: 1, kind: input, shape index: {}]   ;;  %s953_s2 = inlined_call_operand.hbm [shape: f32[2,32,64], index: 2, kind: output, shape index: {}]  }
   0x1   :  { %8 = vsyncpa [#allocation6], 0 }
   0x2   :  { %10 = vsyncpa [#allocation6 + $0x1], 0 }
   0x3   :  { %11 = vsyncpa [#allocation4], 0 }
   0x4   :  { %13 = vsyncpa [#allocation4 + $0x1], 0  ;;  %s722_s9 = smov 0   ;;  %s724_s10 = smov 0  }
   0x5   :  { %s726_s11 = smov 0   ;;  %s728_s12 = smov 0  }
   0x6   :  { %s730_s13 = smov 0   ;;  %s732_s14 = smov 0  }
   0x7 LB: > { %s420_s15 = sadd.s32 4294967295, %s698_s14   ;;  %s421_s16 = sadd.s32 4294967294, %s698_s14   ;;  %s698_s14 = sphi %s732_s14, %s19_s14   ;;  %s694_s13 = sphi %s730_s13, %s977_s13   ;;  %s690_s12 = sphi %s728_s12, %s976_s12   ;;  %s686_s11 = sphi %s726_s11, %s975_s11   ;;  %s682_s10 = sphi %s724_s10, %s974_s10   ;;  %s678_s9 = sphi %s722_s9, %s973_s9  }
   0x8   : > { %p74_p0 = scmp.ne.s32.totalorder %s682_s10, %s678_s9  ;;  %p756_p1 = scmp.eq.s32.totalorder %s420_s15, 0 }
   0x9   : > { %p760_p2 = scmp.eq.s32.totalorder %s420_s15, 1  ;;  %p106_p3 = scmp.eq.s32.totalorder %s421_s16, 1 }
   0xa   : > { %s958_s17 = scalar_select %p756_p1, 1, 0 }
   0xb   : > { %s959_s18 = scalar_select %p760_p2, 1, 0 }
   0xc   : > { %p766_p4 = por %p756_p1, %p74_p0  ;;  %p422_p5 = scmp.ge.s32.totalorder %s698_s14, 1 }
   0xd   : > { %p771_p6 = por %p106_p3, %p74_p0  ;;  %p113_p7 = scmp.lt.s32.totalorder %s698_s14, 3 }
   0xe   : > { %s960_s19 = scalar_select %p766_p4, 1, 0 }
   0xf   : > { %s961_s20 = scalar_select %p771_p6, 1, 0 }
  0x10   : > { %p776_p8 = pnand %p422_p5, %p113_p7  ;;  %s700_s22 = smov [#allocation2]  }
  0x11   : > { %s125_s23 = sshll.u32 %s700_s22, 4  ;;  %s31_s25 = sadd.s32 1, %s694_s13  ;;  %s126_s23 = int_to_ptr.vmem [resolvable:$true] %s125_s23 }
  0x12   : > { %s962_s21 = scalar_select %p776_p8, 1, 0 }
  0x13   : > { %p485_p9 = pneg %p776_p8  ;;  %s554_s28 = scalar_lea.hbm %s951_s0, 512 }
  0x14   : > { %p555_p12 = scmp.ne.s32.totalorder %s951_s0, %s554_s28  ;;  %p561_p5 = scmp.lt.u32.totalorder %s554_s28, %s951_s0 }
  0x15   : > { %p785_p11 = pnand %p485_p9, %p756_p1 }
  0x17   : > { %p556_p13 = pneg %p785_p11 }
  0x19   : > { %p557_p0 = pnand %p556_p13, %p555_p12 }
  0x1b   : > { %p558_p3 = pneg %p557_p0 }
  0x1d   : > { %p563_p7 = pnand %p561_p5, %p558_p3 }
  0x1f   : > { %566 = shalt.err (!%p563_p7)
}
  0x20   : > { %s567_s5 = scalar_lea.vmem %s126_s23, 512  ;;  %p575_p4 = scmp.lt.s32.totalorder %s126_s23, %s126_s23 }
  0x21   : > { %p568_p9 = scmp.ne.s32.totalorder %s126_s23, %s567_s5  ;;  %p576_p1 = scmp.lt.s32.totalorder %s567_s5, %s567_s5 }
  0x23   : > { %p570_p10 = pnand %p568_p9, %p556_p13  ;;  %p577_p8 = por %p576_p1, %p575_p4 }
  0x25   : > { %p571_p6 = pneg %p570_p10 }
  0x27   : > { %p578_p2 = pnand %p577_p8, %p571_p6 }
  0x29   : > { %581 = shalt.err (!%p578_p2)
}
  0x2a   : > { %s701_s6 = smov 128   ;;  %s702_s7 = smov 8  }
  0x2b   : > { %488 = dma.hbm_to_vmem [thread:$0]  (!%p785_p11), %s951_s0, 512, %s126_s23, [#allocation3], %s701_s6, %s701_s6, %s702_s7  }
  0x2c   : > { %p33_p1 = scmp.ge.s32.totalorder %s31_s25, 2  ;;  %s61_s16 = sadd.s32 1, %s686_s11 }
  0x2d   : > { %p68_p2 = scmp.ne.s32.totalorder %s686_s11, %s682_s10  ;;  %p69_p4 = scmp.eq.s32.totalorder %s698_s14, 0 }
  0x2e   : > { %s979_s25 = smov (%p33_p1, %s31_s25), 0  ;;  %p965_p8 = scmp.ne.s32.totalorder %s959_s18, 0 }
  0x2f   : > { %p815_p6 = por %p69_p4, %p68_p2  ;;  %s56_s26 = ssub.s32 %s694_s13, %s979_s25 }
  0x30   : > { %p821_p10 = por %p965_p8, %p68_p2  ;;  %p498_p12 = scmp.lt.s32.totalorder %s698_s14, 2 }
  0x31   : > { %p59_p11 = scmp.eq.s32.totalorder %s56_s26, 0  ;;  %s139_s23 = sand.u32 1, %s686_s11  }
  0x32   : > { %s425_s27 = sshll.u32 %s139_s23, 5  ;;  %s441_s29 = sshll.u32 %s694_s13, 9 }
  0x33   : > { %s830_s28 = scalar_select %p59_p11, %s686_s11, %s61_s16  }
  0x34   : > { %s836_s4 = scalar_lea.hbm %s952_s1, %s441_s29  ;;  %s143_s18 = scalar_lea.vmem [#allocation5], %s425_s27 }
  0x35   : > { %s151_s5 = sshll.u32 %s143_s18, 4  ;;  %p842_p13 = pnand %p498_p12, %p815_p6  ;;  %s838_s5 = int_to_ptr.vmem [resolvable:$true] %s151_s5 }
  0x36   : > { %s846_s15 = scalar_lea.sflag [#allocation6], %s139_s23  ;;  %s582_s16 = scalar_lea.hbm %s836_s4, 512 }
  0x37   : > { %p583_p0 = scmp.ne.s32.totalorder %s836_s4, %s582_s16  ;;  %p584_p3 = pneg %p842_p13 }
  0x38   : > { %s587_s22 = scalar_lea.hbm %s952_s1, 1024  ;;  %p588_p9 = scmp.lt.u32.totalorder %s836_s4, %s952_s1 }
  0x39   : > { %p585_p5 = pnand %p584_p3, %p583_p0  ;;  %p589_p1 = scmp.lt.u32.totalorder %s587_s22, %s582_s16 }
  0x3a   : > { %p591_p4 = scmp.lt.u32.totalorder %s582_s16, %s836_s4 }
  0x3b   : > { %p586_p7 = pneg %p585_p5  ;;  %p590_p2 = por %p589_p1, %p588_p9 }
  0x3d   : > { %p592_p6 = por %p591_p4, %p590_p2 }
  0x3f   : > { %p593_p8 = pnand %p592_p6, %p586_p7 }
  0x41   : > { %596 = shalt.err (!%p593_p8)
}
  0x42   : > { %s597_s23 = scalar_lea.vmem %s838_s5, 512  ;;  %s703_s3 = smov [#allocation5]  }
  0x43   : > { %p598_p12 = scmp.ne.s32.totalorder %s838_s5, %s597_s23  ;;  %s602_s18 = sshll.u32 %s703_s3, 4  ;;  %s603_s18 = int_to_ptr.vmem [resolvable:$false] %s602_s18 }
  0x44   : > { %s604_s26 = scalar_lea.vmem %s603_s18, 1024  ;;  %p605_p5 = scmp.lt.s32.totalorder %s838_s5, %s603_s18 }
  0x45   : > { %p600_p11 = pnand %p598_p12, %p584_p3  ;;  %p606_p9 = scmp.lt.s32.totalorder %s604_s26, %s597_s23 }
  0x47   : > { %p601_p0 = pneg %p600_p11  ;;  %p607_p1 = por %p606_p9, %p605_p5 }
  0x49   : > { %p608_p2 = pnand %p607_p1, %p601_p0 }
  0x4b   : > { %611 = shalt.err (!%p608_p2)
}
  0x4c   : > { %492 = dma.hbm_to_vmem [thread:$0]  (!%p842_p13), %s836_s4, 512, %s838_s5, %s846_s15, %s701_s6, %s701_s6, %s702_s7  }
  0x4d   : > { %p968_p3 = scmp.ne.s32.totalorder %s962_s21, 0 }
  0x4e   : > { %p969_p7 = scmp.ne.s32.totalorder (!%p968_p3), %s958_s17, 0 }
  0x4f   : > { %163 = sbr.rel (%p968_p3) target bundleno = 333 (0x14d), region = 28 }
  0x56   : > { %665 = dma.done.wait (%p969_p7), [#allocation3], 512  }
  0x57   : > { %667 = vsyncadd (%p969_p7), [#allocation3], 4294966784  ;;  %s884_s16 = sand.u32 1, %s682_s10   ;;  %p970_p4 = scmp.ne.s32.totalorder %s960_s19, 0 }
  0x58   : > { %s430_s8 = sshll.u32 %s884_s16, 5  ;;  %s170_s27 = scalar_lea.sflag [#allocation6], %s884_s16 }
  0x59   : > { %s173_s22 = scalar_lea.vmem [#allocation5], %s430_s8 }
  0x5a   : > { %669 = dma.done.wait (%p970_p4), %s170_s27, 512  }
  0x5b   : > { %671 = vsyncadd (%p970_p4), %s170_s27, 4294966784  ;;  %vm202_vm0 = vcmask 261120   ;;  %v198_v0 = vld [vmem:[%s173_s22] sm:$0xff]  ;;  %v199_v1 = vld [vmem:[%s173_s22 + $0x8] sm:$0xff]  ;;  %s193_s17 = scalar_lea.vmem [#allocation7], %s430_s8  ;;  %s442_s21 = sshll.u32 %s690_s12, 9 }
  0x5c   : > { %v200_v2 = vld [vmem:[%s173_s22 + $0x10] sm:$0xff]  ;;  %v465_v3 = vpack.c.bf16 %v199_v1, %v198_v0  ;;  %v201_v4 = vld [vmem:[%s173_s22 + $0x18] sm:$0xff]  ;;  %v194_v5 = vld [vmem:[#allocation2] sm:$0xff]  ;;  %s323_s19 = sshll.u32 %s193_s17, 4  ;;  %s902_s4 = scalar_lea.hbm %s953_s2, %s442_s21  ;;  %s897_s19 = int_to_ptr.vmem [resolvable:$true] %s323_s19 }
  0x5d   : > { %v196_v6 = vld [vmem:[#allocation2 + $0x10] sm:$0xff]  ;;  %v469_v7 = vpack.c.bf16 %v201_v4, %v200_v2  ;;  %459 = vmatprep.mubr.msk.f32.mxu0 %vm202_vm0, %v194_v5  ;;  %v195_v8 = vld [vmem:[#allocation2 + $0x8] sm:$0xff]  ;;  %v197_v9 = vld [vmem:[#allocation2 + $0x18] sm:$0xff]  ;;  %s309_s12 = scalar_lea.sflag [#allocation4], %s884_s16  ;;  %s612_s5 = scalar_lea.vmem %s897_s19, 512 }
  0x5e   : > { %462 = vmatprep.mubr.msk.f32.mxu1 %vm202_vm0, %v196_v6  ;;  %466 = vmatprep.subr.bf16.mxu0 %v465_v3  ;;  %p613_p13 = scmp.ne.s32.totalorder %s897_s19, %s612_s5  ;;  %s704_s15 = smov [#allocation7]  }
  0x5f   : > { %473 = vmatprep.subr.bf16.mxu1 %v465_v3  ;;  %468 = vmatpush3.bf16.msra.mxu0 %v465_v3  ;;  %s616_s29 = sshll.u32 %s704_s15, 4  ;;  %s617_s29 = int_to_ptr.vmem [resolvable:$false] %s616_s29 }
  0x60   : > { %475 = vmatpush3.bf16.msra.mxu1 %v465_v3  ;;  %470 = vmatprep.subr.bf16.mxu0 %v469_v7  ;;  %p614_p6 = pnand %p613_p13, %p821_p10  ;;  %s618_s30 = scalar_lea.vmem %s617_s29, 1024 }
  0x61   : > { %474 = vmatprep.subr.bf16.mxu1 %v469_v7  ;;  %p619_p12 = scmp.lt.s32.totalorder %s897_s19, %s617_s29  ;;  %p620_p11 = scmp.lt.s32.totalorder %s618_s30, %s612_s5 }
  0x62   : > { %p615_p8 = pneg %p614_p6 }
  0x63   : > { %472 = vmatpush3.bf16.msra.mxu0 %v469_v7  ;;  %p621_p0 = por %p620_p11, %p619_p12 }
  0x64   : > { %476 = vmatpush3.bf16.msra.mxu1 %v469_v7 }
  0x65   : > { %p622_p5 = pnand %p621_p0, %p615_p8 }
  0x66   : > { %460 = vmatmul.mubr.msk.f32.vlgmr.msra.gmra.mrb[0].mxu0 %vm202_vm0, %v195_v8 }
  0x67   : > { %463 = vmatmul.mubr.msk.f32.vlgmr.msra.gmra.mrb[0].mxu1 %vm202_vm0, %v197_v9 }
 0x139   : > { %v461_v10 = vpop.f32.mrb[0].mxu0 }
 0x13a   : > { %v464_v11 = vpop.f32.mrb[0].mxu1  ;;  %v301_v12 = vmax.f32 %v461_v10, 0.0  ;;  %v281_v14 = vpop.f32.mrb[1].mxu0 }
 0x13b   : > { %v303_v13 = vmax.f32 %v464_v11, 0.0  ;;  %v291_v15 = vpop.f32.mrb[1].mxu1  ;;  %v300_v16 = vmax.f32 %v281_v14, 0.0 }
 0x13c   : > { %v302_v17 = vmax.f32 %v291_v15, 0.0  ;;  %305 = vst [vmem:[%s193_s17 + $0x8] sm:$0xff] %v301_v12 }
 0x13d   : > { %307 = vst [vmem:[%s193_s17 + $0x18] sm:$0xff] %v303_v13  ;;  %304 = vst [vmem:[%s193_s17] sm:$0xff] %v300_v16 }
 0x13e   : > { %306 = vst [vmem:[%s193_s17 + $0x10] sm:$0xff] %v302_v17 }
 0x13f   : > { %625 = shalt.err (!%p622_p5)
}
 0x140   : > { %s626_s23 = scalar_lea.hbm %s902_s4, 512  ;;  %s630_s26 = scalar_lea.hbm %s953_s2, 1024 }
 0x141   : > { %p627_p9 = scmp.ne.s32.totalorder %s902_s4, %s626_s23  ;;  %p631_p3 = scmp.lt.u32.totalorder %s902_s4, %s953_s2 }
 0x142   : > { %p632_p7 = scmp.lt.u32.totalorder %s630_s26, %s626_s23  ;;  %p634_p13 = scmp.lt.u32.totalorder %s626_s23, %s902_s4 }
 0x143   : > { %p628_p1 = pnand %p627_p9, %p821_p10 }
 0x144   : > { %p633_p4 = por %p632_p7, %p631_p3 }
 0x145   : > { %p629_p2 = pneg %p628_p1 }
 0x146   : > { %p635_p6 = por %p634_p13, %p633_p4 }
 0x148   : > { %p636_p8 = pnand %p635_p6, %p629_p2 }
 0x14a   : > { %639 = shalt.err (!%p636_p8)
}
 0x14b   : > { %s705_s22 = smov 128   ;;  %s706_s17 = smov 8  }
 0x14c   : > { %483 = dma.vmem_to_hbm [thread:$0]  (%p821_p10), %s897_s19, 512, %s902_s4, %s309_s12, %s705_s22, %s705_s22, %s706_s17  }
 0x14d PF: > { %s338_s21 = sand.u32 1, %s678_s9   ;;  %p971_p12 = scmp.ne.s32.totalorder %s961_s20, 0 }
 0x14e   : > { %p972_p11 = scmp.ge.s32.totalorder %s698_s14, 2  ;;  %s339_s6 = scalar_lea.sflag [#allocation4], %s338_s21 }
 0x150   : > { %p494_p0 = pnand %p972_p11, %p971_p12 }
 0x152   : > { %673 = dma.done.wait (!%p494_p0), %s339_s6, 512  }
 0x153   : > { %675 = vsyncadd (!%p494_p0), %s339_s6, 4294966784  ;;  %s19_s14 = sadd.s32 1, %s698_s14   ;;  %s973_s9 = smov %s682_s10 }
 0x154   : > { %p16_p5 = scmp.ge.s32.totalorder %s19_s14, 4   ;;  %s974_s10 = smov %s686_s11 }
 0x155   : > { %s975_s11 = smov %s830_s28  ;;  %s976_s12 = smov %s694_s13 }
 0x156   : > { %s977_s13 = smov %s979_s25  ;;  %18 = sbr.rel (!%p16_p5) target bundleno = 7 (0x7), region = 78 }
 0x15d   :  { %344 = vsyncpa [#allocation3], 1 }
 0x15e   :  { %346 = vsyncpa [#allocation3 + $0x1], 1 }
 0x15f   :  { %347 = vsyncpa [#allocation6], 1 }
 0x160   :  { %349 = vsyncpa [#allocation6 + $0x1], 1 }
 0x161   :  { %350 = vsyncpa [#allocation4], 1 }
 0x162   :  { %352 = vsyncpa [#allocation4 + $0x1], 1 }

</bundles_post_ra>
